<compile_context>
chip_gen: v7x
topology: tpu7x:2x2x1
jax: 0.10.0
libtpu: 0.0.40
codegen_flags: <defaults>
</compile_context>

<pallas_src>
import functools
import math

import jax
import jax.numpy as jnp
from jax import lax
from jax.experimental import pallas as pl
from jax.experimental.pallas import tpu as pltpu


# --------------------------------------------------------------------------------------
# Hardware introspection helpers (generation-aware tiling / dtype choices).
# --------------------------------------------------------------------------------------
def _device_kind():
    try:
        return jax.devices()[0].device_kind.lower()
    except Exception:
        return ""


def _vmem_capacity_bytes():
    try:
        cap = getattr(pltpu.get_tpu_info(), "vmem_capacity_bytes", None)
        if cap:
            return int(cap)
    except Exception:
        pass
    kind = _device_kind()
    if kind and "v7" not in kind:
        return 128 * 1024 * 1024          # v2..v6: 128 MiB VMEM per TensorCore
    return 64 * 1024 * 1024               # v7x (or unknown): be conservative


def _default_exp_dtype(compute_dtype):
    """bf16 exp on v6e/v7x (2x EUP rate); f32 exp on v5e-and-older (no bf16 EUP)."""
    if jnp.dtype(compute_dtype) != jnp.dtype(jnp.bfloat16):
        return jnp.float32
    kind = _device_kind()
    for old in ("v2", "v3", "v4", "v5"):
        if old in kind:
            return jnp.float32
    return jnp.bfloat16


def _round_up(x, m):
    return (x + m - 1) // m * m


def _pick_tile(n, target):
    """Largest tile <= target that divides n with the sublane dim a multiple of 8."""
    if n <= target:
        return n
    for t in range(target, 0, -1):
        if n % t == 0 and t % 8 == 0:
            return t
    return n


# --------------------------------------------------------------------------------------
# K/V projection kernel: X @ W per head, emitted head-major (B, h, nk, d).
# Runs once per (batch, k-tile) — hoisted out of the attention grid.
# --------------------------------------------------------------------------------------
def _kv_proj_kernel(k_ref, v_ref, wk_ref, wv_ref, kh_ref, vh_ref, *, num_heads):
    k = k_ref[0]
    v = v_ref[0]
    for i in range(num_heads):            # head index is a LEADING dim: no lane slicing
        kh_ref[0, i] = jnp.dot(k, wk_ref[i],
                               preferred_element_type=jnp.float32).astype(kh_ref.dtype)
        vh_ref[0, i] = jnp.dot(v, wv_ref[i],
                               preferred_element_type=jnp.float32).astype(vh_ref.dtype)


def _project_kv(K, V, Wk3, Wv3, *, num_heads, tn, vmem_cap):
    B, nk, ks = K.shape
    vs = V.shape[-1]
    h, _, d = Wk3.shape
    cdt = K.dtype
    csz = jnp.dtype(cdt).itemsize

    fp = (2 * tn * (ks + vs) * csz            # K/V input blocks (double-buffered)
          + 2 * 2 * h * tn * d * csz          # Kh/Vh output blocks (double-buffered)
          + 2 * h * (ks + vs) * d * csz)      # resident weights (double-buffered by default)
    vmem_limit = int(min(max(4 * fp, 32 << 20), 0.9 * vmem_cap))

    cost = pl.CostEstimate(
        flops=int(2 * B * nk * (ks + vs) * h * d),
        transcendentals=0,
        bytes_accessed=int(B * nk * (ks + vs) * csz + 2 * B * h * nk * d * csz
                           + h * (ks + vs) * d * csz),
    )

    grid_spec = pltpu.PrefetchScalarGridSpec(
        num_scalar_prefetch=0,
        grid=(B, nk // tn),
        in_specs=[
            pl.BlockSpec((1, tn, ks), lambda b, ni: (b, ni, 0)),
            pl.BlockSpec((1, tn, vs), lambda b, ni: (b, ni, 0)),
            pl.BlockSpec((h, ks, d), lambda b, ni: (0, 0, 0)),   # resident (constant index)
            pl.BlockSpec((h, vs, d), lambda b, ni: (0, 0, 0)),   # resident (constant index)
        ],
        out_specs=[
            pl.BlockSpec((1, h, tn, d), lambda b, ni: (b, 0, ni, 0)),
            pl.BlockSpec((1, h, tn, d), lambda b, ni: (b, 0, ni, 0)),
        ],
    )
    return pl.pallas_call(
        functools.partial(_kv_proj_kernel, num_heads=num_heads),
        grid_spec=grid_spec,
        out_shape=(jax.ShapeDtypeStruct((B, h, nk, d), cdt),
                   jax.ShapeDtypeStruct((B, h, nk, d), cdt)),
        compiler_params=pltpu.CompilerParams(
            dimension_semantics=("parallel", "parallel"),
            vmem_limit_bytes=vmem_limit),
        cost_estimate=cost,
    )(K, V, Wk3, Wv3)


# --------------------------------------------------------------------------------------
# Fused flash attention + Q projection + output projection kernel.
# Grid = (batch, q-tiles, k-chunks); k-chunk axis is "arbitrary" (online softmax).
# --------------------------------------------------------------------------------------
def _attn_kernel(maxlen_ref,                                      # scalar prefetch (SMEM)
                 vl_ref, q_ref, kh_ref, vh_ref, wq_ref, wo_ref,   # inputs
                 o_ref,                                           # output
                 q_sc, m_sc, l_sc, acc_sc,                        # scratch
                 *, num_heads, scale, exp_dtype):
    b = pl.program_id(0)
    qi = pl.program_id(1)
    ki = pl.program_id(2)
    nkt = pl.num_programs(2)

    h = num_heads
    tq = q_ref.shape[1]
    tk = kh_ref.shape[2]
    Hp = wo_ref.shape[2]

    # ---- once per (batch, q-tile): project + scale the query tile into head-major scratch,
    #      reset the online-softmax state. ------------------------------------------------
    @pl.when(ki == 0)
    def _():
        x = q_ref[0]                                              # (tq, query_size)
        for i in range(h):                                        # leading-dim head writes
            q_sc[i] = (jnp.dot(x, wq_ref[i], preferred_element_type=jnp.float32)
                       * scale).astype(q_sc.dtype)
        m_sc[...] = jnp.full_like(m_sc, -jnp.inf)
        l_sc[...] = jnp.zeros_like(l_sc)
        acc_sc[...] = jnp.zeros_like(acc_sc)

    # ---- per k-chunk: skip all compute when every key in this chunk is masked for every
    #      query row of the tile (chunk's K/V DMA is also suppressed by the index_map). ----
    max_len = maxlen_ref[b, qi]

    @pl.when(ki * tk < max_len)
    def _():
        qh = q_sc[...]                                            # (h, tq, d)
        kh = kh_ref[0]                                            # (h, tk, d)
        vh = vh_ref[0]                                            # (h, tk, d)

        s = jnp.einsum('hqd,hkd->hqk', qh, kh,
                       preferred_element_type=jnp.float32)        # (h, tq, tk)

        vl = vl_ref[0]                                            # (tq, 1) int32
        col = ki * tk + lax.broadcasted_iota(jnp.int32, (tq, tk), 1)
        mask = (col < vl)[None]                                   # broadcast over heads
        s = jnp.where(mask, s, jnp.float32(-1e20))

        m_prev = m_sc[...]                                        # (h, tq, 1) f32
        m_new = jnp.maximum(m_prev, jnp.max(s, axis=-1, keepdims=True))
        alpha = jnp.exp(m_prev - m_new)                           # f32 bookkeeping
        p = jnp.exp((s - m_new).astype(exp_dtype))                # bf16 exp on v6e/v7x
        l_sc[...] = alpha * l_sc[...] + jnp.sum(p.astype(jnp.float32),
                                                axis=-1, keepdims=True)
        acc_sc[...] = alpha * acc_sc[...] + jnp.einsum(
            'hqk,hkd->hqd', p.astype(vh.dtype), vh,
            preferred_element_type=jnp.float32)
        m_sc[...] = m_new

    # ---- once per (batch, q-tile): normalize and apply the output projection.  The padded
    #      (tq, Hp) result keeps the epilogue store lane-dense even when num_hiddens < 128. -
    @pl.when(ki == nkt - 1)
    def _():
        l = l_sc[...]
        l = jnp.where(l == 0.0, jnp.float32(1.0), l)              # guard: fully-skipped rows
        inv_l = pl.reciprocal(l, approx=True)                     # EUP, not a VPU divide
        oh = (acc_sc[...] * inv_l).astype(wo_ref.dtype)           # (h, tq, d)
        out = jnp.zeros((tq, Hp), jnp.float32)
        for i in range(h):                                        # per-head out-proj, accumulated
            out = out + jnp.dot(oh[i], wo_ref[i], preferred_element_type=jnp.float32)
        o_ref[0] = out.astype(o_ref.dtype)


def _attn_vmem_bytes(h, tq, tk, d, qs, Hp, csz, osz):
    b = 0
    b += 2 * tq * 1 * 4                           # valid-lens block (2 buffers)
    b += 2 * tq * qs * csz                        # Q block
    b += 2 * 2 * h * tk * d * csz                 # Kh + Vh blocks
    b += 2 * h * (qs + Hp) * d * csz              # resident Wq / Wo (double-buffered default)
    b += 2 * tq * Hp * osz                        # output block
    b += h * tq * d * csz                         # projected-query scratch
    b += 2 * h * tq * 4                           # running max / denom
    b += h * tq * d * 4                           # accumulator
    b += 4 * h * tq * tk * 4                      # score / prob / mask temporaries (headroom)
    b += tq * Hp * 4                              # epilogue accumulator
    return b


def multi_head_attention(Q, K, V, Wq, Wk, Wv, Wo, num_heads, valid_lens=None, *,
                         compute_dtype=jnp.bfloat16, out_dtype=None,
                         block_q=None, block_k=None, exp_dtype=None):
    """Pallas MHA forward. Q:(B,nq,qs) K:(B,nk,ks) V:(B,nk,vs); Wq:(qs,H) Wk:(ks,H) Wv:(vs,H) Wo:(H,H)."""
    B, nq, qs = Q.shape
    _, nk, ks = K.shape
    vs = V.shape[-1]
    H = Wq.shape[-1]
    h = num_heads
    assert H % h == 0, "num_hiddens must be divisible by num_heads"
    d = H // h

    cdt = jnp.dtype(compute_dtype)
    odt = jnp.dtype(out_dtype) if out_dtype is not None else cdt
    if exp_dtype is None:
        exp_dtype = _default_exp_dtype(cdt)
    csz, osz = cdt.itemsize, odt.itemsize

    # Lane-dense output: pad the out-projection width to a multiple of 128 (sliced later).
    Hp = _round_up(H, 128)

    # Head-major weights (head i owns hidden columns [i*d, (i+1)*d) of each projection).
    Wq3 = Wq.astype(cdt).reshape(qs, h, d).transpose(1, 0, 2)     # (h, qs, d)
    Wk3 = Wk.astype(cdt).reshape(ks, h, d).transpose(1, 0, 2)     # (h, ks, d)
    Wv3 = Wv.astype(cdt).reshape(vs, h, d).transpose(1, 0, 2)     # (h, vs, d)
    Wo3 = Wo.astype(cdt).reshape(h, d, H)                         # (h, d, H)
    if Hp != H:
        Wo3 = jnp.pad(Wo3, ((0, 0), (0, 0), (0, Hp - H)))

    Qc, Kc, Vc = Q.astype(cdt), K.astype(cdt), V.astype(cdt)

    # ---- generation-aware tiling. --------------------------------------------------------
    vmem_cap = _vmem_capacity_bytes()
    big_vmem = vmem_cap >= 96 * 1024 * 1024
    if block_q is None:
        block_q = 512 if big_vmem else 256           # v5e/v6e (128 MiB) vs v7x (64 MiB)
    if block_k is None:
        block_k = 1024 if big_vmem else 256

    tq = _pick_tile(nq, block_q)
    tk = _pick_tile(nk, block_k)
    while B * (nq // tq) < 2 and tq % 16 == 0:       # keep both v7x TensorCores busy
        tq //= 2
    budget = int(0.85 * vmem_cap)
    while _attn_vmem_bytes(h, tq, tk, d, qs, Hp, csz, osz) > budget and tk % 16 == 0:
        tk //= 2
    while _attn_vmem_bytes(h, tq, tk, d, qs, Hp, csz, osz) > budget and tq % 16 == 0:
        tq //= 2
    nqt, nkt = nq // tq, nk // tk

    # ---- hoisted K/V projections: once per (batch, k-tile), NOT once per q-tile. ----------
    tn = _pick_tile(nk, 1024 if big_vmem else 512)
    Kh, Vh = _project_kv(Kc, Vc, Wk3, Wv3, num_heads=h, tn=tn, vmem_cap=vmem_cap)

    # ---- valid-length handling. ------------------------------------------------------------
    if valid_lens is None:
        vl2d = jnp.full((B, nq), nk, dtype=jnp.int32)
    elif valid_lens.ndim == 1:
        vl2d = jnp.broadcast_to(valid_lens.astype(jnp.int32)[:, None], (B, nq))
    else:
        vl2d = valid_lens.astype(jnp.int32)
    vl3 = vl2d[:, :, None]                                        # (B, nq, 1)

    # Per-(batch, q-tile) max valid length -> SMEM (scalar prefetch) for chunk skipping.
    # A tile containing a valid_len==0 row processes every chunk so the reference's
    # "uniform attention over all keys" behaviour for such rows is reproduced exactly.
    vt = vl2d.reshape(B, nqt, tq)
    maxlens = jnp.where(vt.min(axis=-1) == 0, nk, vt.max(axis=-1)).astype(jnp.int32)

    # ---- attention + output projection. ------------------------------------------------------
    est = _attn_vmem_bytes(h, tq, tk, d, qs, Hp, csz, osz)
    vmem_limit = int(min(max(est + est // 4 + (2 << 20), 32 << 20), budget))

    def _kv_block(bi, qi, ki, ml):
        # Clamp the chunk index so fully-masked chunks re-use the previous block (no re-DMA).
        needed = jnp.maximum((ml[bi, qi] + tk - 1) // tk, 1)
        return (bi, 0, jnp.minimum(ki, needed - 1), 0)

    grid_spec = pltpu.PrefetchScalarGridSpec(
        num_scalar_prefetch=1,
        grid=(B, nqt, nkt),
        in_specs=[
            pl.BlockSpec((1, tq, 1), lambda bi, qi, ki, ml: (bi, qi, 0)),     # valid lens
            pl.BlockSpec((1, tq, qs), lambda bi, qi, ki, ml: (bi, qi, 0)),    # raw Q tile
            pl.BlockSpec((1, h, tk, d), _kv_block),                           # Kh chunk
            pl.BlockSpec((1, h, tk, d), _kv_block),                           # Vh chunk
            pl.BlockSpec((h, qs, d), lambda bi, qi, ki, ml: (0, 0, 0)),       # Wq (resident)
            pl.BlockSpec((h, d, Hp), lambda bi, qi, ki, ml: (0, 0, 0)),       # Wo (resident)
        ],
        out_specs=pl.BlockSpec((1, tq, Hp), lambda bi, qi, ki, ml: (bi, qi, 0)),
        scratch_shapes=[
            pltpu.VMEM((h, tq, d), cdt),             # scaled, projected query tile (head-major)
            pltpu.VMEM((h, tq, 1), jnp.float32),     # running max
            pltpu.VMEM((h, tq, 1), jnp.float32),     # running denominator
            pltpu.VMEM((h, tq, d), jnp.float32),     # running numerator
        ],
    )

    cost = pl.CostEstimate(
        flops=int(2 * B * nq * qs * H + 4 * B * h * nq * nk * d + 2 * B * nq * H * Hp),
        transcendentals=int(B * h * nq * nk),
        bytes_accessed=int(B * nq * qs * csz + 2 * B * h * nk * d * csz
                           + h * (qs + Hp) * d * csz + B * nq * 4 + B * nq * Hp * osz),
    )

    out = pl.pallas_call(
        functools.partial(_attn_kernel, num_heads=h, scale=1.0 / math.sqrt(d),
                          exp_dtype=exp_dtype),
        grid_spec=grid_spec,
        out_shape=jax.ShapeDtypeStruct((B, nq, Hp), odt),
        compiler_params=pltpu.CompilerParams(
            dimension_semantics=("parallel", "parallel", "arbitrary"),
            vmem_limit_bytes=vmem_limit),
        cost_estimate=cost,
    )(maxlens, vl3, Qc, Kh, Vh, Wq3, Wo3)

    return out[..., :H] if Hp != H else out


# --------------------------------------------------------------------------------------
# Pure-JAX reference mirroring the PyTorch module.
# --------------------------------------------------------------------------------------
def multi_head_attention_ref(Q, K, V, Wq, Wk, Wv, Wo, num_heads, valid_lens=None):
    B, nq, _ = Q.shape
    nk = K.shape[1]
    H = Wq.shape[-1]
    h = num_heads
    d = H // h

    def split(X):
        Bn, n, _ = X.shape
        return X.reshape(Bn, n, h, d).transpose(0, 2, 1, 3)       # (B, h, n, d)

    Qh, Kh, Vh = split(Q @ Wq), split(K @ Wk), split(V @ Wv)
    S = jnp.einsum('bhqd,bhkd->bhqk', Qh, Kh) / math.sqrt(d)
    if valid_lens is not None:
        if valid_lens.ndim == 1:
            vl = valid_lens[:, None, None, None]                  # (B,1,1,1)
        else:
            vl = valid_lens[:, None, :, None]                     # (B,1,nq,1)
        S = jnp.where(jnp.arange(nk)[None, None, None, :] < vl, S, -1e20)
    W = jax.nn.softmax(S, axis=-1)
    Oh = jnp.einsum('bhqk,bhkd->bhqd', W, Vh)
    O = Oh.transpose(0, 2, 1, 3).reshape(B, nq, H)
    return O @ Wo


if __name__ == "__main__":
    key = jax.random.PRNGKey(0)
    B, nq, nk = 2, 8, 16
    query_size = key_size = value_size = 16
    num_heads, num_hiddens = 4, 32

    ks_ = jax.random.split(key, 7)
    Q = jax.random.normal(ks_[0], (B, nq, query_size), jnp.float32)
    K = jax.random.normal(ks_[1], (B, nk, key_size), jnp.float32)
    V = jax.random.normal(ks_[2], (B, nk, value_size), jnp.float32)
    # Deterministic "LazyLinear" weights (bias=False), small init scale.
    Wq = 0.1 * jax.random.normal(ks_[3], (query_size, num_hiddens), jnp.float32)
    Wk = 0.1 * jax.random.normal(ks_[4], (key_size, num_hiddens), jnp.float32)
    Wv = 0.1 * jax.random.normal(ks_[5], (value_size, num_hiddens), jnp.float32)
    Wo = 0.1 * jax.random.normal(ks_[6], (num_hiddens, num_hiddens), jnp.float32)

    valid_lens_1d = jnp.array([5, 16], dtype=jnp.int32)
    valid_lens_2d = jnp.broadcast_to(jnp.arange(1, nq + 1, dtype=jnp.int32)[None, :], (B, nq))

    # f32 compute path, 1-D valid_lens (per-batch lengths).
    out = jax.block_until_ready(multi_head_attention(
        Q, K, V, Wq, Wk, Wv, Wo, num_heads, valid_lens_1d, compute_dtype=jnp.float32))
    ref = multi_head_attention_ref(Q, K, V, Wq, Wk, Wv, Wo, num_heads, valid_lens_1d)
    assert out.shape == (B, nq, num_hiddens)
    assert jnp.allclose(out, ref, atol=2e-3, rtol=2e-3), "f32 / 1-D valid_lens mismatch"

    # f32 compute path, 2-D valid_lens (per-query lengths).
    out2 = jax.block_until_ready(multi_head_attention(
        Q, K, V, Wq, Wk, Wv, Wo, num_heads, valid_lens_2d, compute_dtype=jnp.float32))
    ref2 = multi_head_attention_ref(Q, K, V, Wq, Wk, Wv, Wo, num_heads, valid_lens_2d)
    assert jnp.allclose(out2, ref2, atol=2e-3, rtol=2e-3), "f32 / 2-D valid_lens mismatch"

    # Default bf16 compute path (f32 accumulation; bf16 exp on v6e/v7x), no masking.
    out3 = jax.block_until_ready(multi_head_attention(
        Q, K, V, Wq, Wk, Wv, Wo, num_heads, None))
    ref3 = multi_head_attention_ref(Q, K, V, Wq, Wk, Wv, Wo, num_heads, None)
    assert jnp.allclose(out3.astype(jnp.float32), ref3, atol=3e-2, rtol=3e-2), "bf16 mismatch"

    # Default bf16 path with 1-D masking.
    out4 = jax.block_until_ready(multi_head_attention(
        Q, K, V, Wq, Wk, Wv, Wo, num_heads, valid_lens_1d))
    ref4 = multi_head_attention_ref(Q, K, V, Wq, Wk, Wv, Wo, num_heads, valid_lens_1d)
    assert jnp.allclose(out4.astype(jnp.float32), ref4, atol=3e-2, rtol=3e-2), "bf16 masked mismatch"

    # Multi-chunk flash path + masked-chunk skipping + a valid_len==0 row (f32, small tiles).
    nq2, nk2 = 16, 64
    ks2 = jax.random.split(jax.random.PRNGKey(1), 3)
    Q2 = jax.random.normal(ks2[0], (B, nq2, query_size), jnp.float32)
    K2 = jax.random.normal(ks2[1], (B, nk2, key_size), jnp.float32)
    V2 = jax.random.normal(ks2[2], (B, nk2, value_size), jnp.float32)
    vl_mix = jnp.stack([jnp.arange(nq2, dtype=jnp.int32),              # includes a 0-length row
                        jnp.full((nq2,), nk2, dtype=jnp.int32)])
    out5 = jax.block_until_ready(multi_head_attention(
        Q2, K2, V2, Wq, Wk, Wv, Wo, num_heads, vl_mix,
        compute_dtype=jnp.float32, block_q=8, block_k=16))
    ref5 = multi_head_attention_ref(Q2, K2, V2, Wq, Wk, Wv, Wo, num_heads, vl_mix)
    assert jnp.allclose(out5, ref5, atol=2e-3, rtol=2e-3), "flash / chunk-skip mismatch"

    print("KERNEL_OK")
</pallas_src>

<mosaic_0001>
module attributes {stable_mosaic.version = 11 : i64} {
  func.func @_kv_proj_kernel(%arg0: i32, %arg1: i32, %arg2: memref<1x16x16xf32, #tpu.memory_space<vmem>>, %arg3: memref<1x16x16xf32, #tpu.memory_space<vmem>>, %arg4: memref<4x16x8xf32, #tpu.memory_space<vmem>>, %arg5: memref<4x16x8xf32, #tpu.memory_space<vmem>>, %arg6: memref<1x4x16x8xf32, #tpu.memory_space<vmem>>, %arg7: memref<1x4x16x8xf32, #tpu.memory_space<vmem>>) attributes {dimension_semantics = [#tpu.dimension_semantics<parallel>, #tpu.dimension_semantics<parallel>], iteration_bounds = array<i64: 2, 1>, scalar_prefetch = 0 : i64, scratch_operands = 0 : i64, tpu.core_type = #tpu.core_type<tc>, window_params = [{transform_indices = @transform_0, window_bounds = array<i64: 1, 16, 16>}, {transform_indices = @transform_1, window_bounds = array<i64: 1, 16, 16>}, {pipeline_mode = #tpu.pipeline_mode<synchronous>, transform_indices = @transform_2, window_bounds = array<i64: 4, 16, 8>}, {pipeline_mode = #tpu.pipeline_mode<synchronous>, transform_indices = @transform_3, window_bounds = array<i64: 4, 16, 8>}, {transform_indices = @transform_4, window_bounds = array<i64: 1, 4, 16, 8>}, {transform_indices = @transform_5, window_bounds = array<i64: 1, 4, 16, 8>}]} {
    %c0 = arith.constant 0 : index
    %c0_0 = arith.constant 0 : index
    %c0_1 = arith.constant 0 : index
    %0 = vector.load %arg2[%c0, %c0_0, %c0_1] : memref<1x16x16xf32, #tpu.memory_space<vmem>>, vector<1x16x16xf32>
    %1 = vector.shape_cast %0 : vector<1x16x16xf32> to vector<16x16xf32>
    %c0_2 = arith.constant 0 : index
    %c0_3 = arith.constant 0 : index
    %c0_4 = arith.constant 0 : index
    %2 = vector.load %arg3[%c0_2, %c0_3, %c0_4] : memref<1x16x16xf32, #tpu.memory_space<vmem>>, vector<1x16x16xf32>
    %3 = vector.shape_cast %2 : vector<1x16x16xf32> to vector<16x16xf32>
    %c0_5 = arith.constant 0 : index
    %c0_6 = arith.constant 0 : index
    %c0_7 = arith.constant 0 : index
    %4 = vector.load %arg4[%c0_5, %c0_6, %c0_7] : memref<4x16x8xf32, #tpu.memory_space<vmem>>, vector<1x16x8xf32>
    %5 = vector.shape_cast %4 : vector<1x16x8xf32> to vector<16x8xf32>
    %cst = arith.constant dense<0.000000e+00> : vector<16x8xf32>
    %6 = tpu.matmul %1, %5, %cst {dimension_numbers = #tpu.dot_dimension_numbers<[1], [0], [0], [1], [0, 0, 1, 1], [], []>} : vector<16x16xf32>, vector<16x8xf32>, vector<16x8xf32> -> vector<16x8xf32>
    %c0_8 = arith.constant 0 : index
    %c0_9 = arith.constant 0 : index
    %c0_10 = arith.constant 0 : index
    %c0_11 = arith.constant 0 : index
    %7 = vector.load %arg6[%c0_8, %c0_9, %c0_10, %c0_11] : memref<1x4x16x8xf32, #tpu.memory_space<vmem>>, vector<1x1x16x8xf32>
    %8 = vector.shape_cast %7 : vector<1x1x16x8xf32> to vector<16x8xf32>
    %9 = vector.shape_cast %6 : vector<16x8xf32> to vector<1x1x16x8xf32>
    tpu.vector_store %arg6[%c0_8, %c0_9, %c0_10, %c0_11], %9 {strides = array<i32>} : memref<1x4x16x8xf32, #tpu.memory_space<vmem>>, vector<1x1x16x8xf32>,
    %c0_12 = arith.constant 0 : index
    %c0_13 = arith.constant 0 : index
    %c0_14 = arith.constant 0 : index
    %10 = vector.load %arg5[%c0_12, %c0_13, %c0_14] : memref<4x16x8xf32, #tpu.memory_space<vmem>>, vector<1x16x8xf32>
    %11 = vector.shape_cast %10 : vector<1x16x8xf32> to vector<16x8xf32>
    %cst_15 = arith.constant dense<0.000000e+00> : vector<16x8xf32>
    %12 = tpu.matmul %3, %11, %cst_15 {dimension_numbers = #tpu.dot_dimension_numbers<[1], [0], [0], [1], [0, 0, 1, 1], [], []>} : vector<16x16xf32>, vector<16x8xf32>, vector<16x8xf32> -> vector<16x8xf32>
    %c0_16 = arith.constant 0 : index
    %c0_17 = arith.constant 0 : index
    %c0_18 = arith.constant 0 : index
    %c0_19 = arith.constant 0 : index
    %13 = vector.load %arg7[%c0_16, %c0_17, %c0_18, %c0_19] : memref<1x4x16x8xf32, #tpu.memory_space<vmem>>, vector<1x1x16x8xf32>
    %14 = vector.shape_cast %13 : vector<1x1x16x8xf32> to vector<16x8xf32>
    %15 = vector.shape_cast %12 : vector<16x8xf32> to vector<1x1x16x8xf32>
    tpu.vector_store %arg7[%c0_16, %c0_17, %c0_18, %c0_19], %15 {strides = array<i32>} : memref<1x4x16x8xf32, #tpu.memory_space<vmem>>, vector<1x1x16x8xf32>,
    %c1 = arith.constant 1 : index
    %c0_20 = arith.constant 0 : index
    %c0_21 = arith.constant 0 : index
    %16 = vector.load %arg4[%c1, %c0_20, %c0_21] : memref<4x16x8xf32, #tpu.memory_space<vmem>>, vector<1x16x8xf32>
    %17 = vector.shape_cast %16 : vector<1x16x8xf32> to vector<16x8xf32>
    %cst_22 = arith.constant dense<0.000000e+00> : vector<16x8xf32>
    %18 = tpu.matmul %1, %17, %cst_22 {dimension_numbers = #tpu.dot_dimension_numbers<[1], [0], [0], [1], [0, 0, 1, 1], [], []>} : vector<16x16xf32>, vector<16x8xf32>, vector<16x8xf32> -> vector<16x8xf32>
    %c0_23 = arith.constant 0 : index
    %c1_24 = arith.constant 1 : index
    %c0_25 = arith.constant 0 : index
    %c0_26 = arith.constant 0 : index
    %19 = vector.load %arg6[%c0_23, %c1_24, %c0_25, %c0_26] : memref<1x4x16x8xf32, #tpu.memory_space<vmem>>, vector<1x1x16x8xf32>
    %20 = vector.shape_cast %19 : vector<1x1x16x8xf32> to vector<16x8xf32>
    %21 = vector.shape_cast %18 : vector<16x8xf32> to vector<1x1x16x8xf32>
    tpu.vector_store %arg6[%c0_23, %c1_24, %c0_25, %c0_26], %21 {strides = array<i32>} : memref<1x4x16x8xf32, #tpu.memory_space<vmem>>, vector<1x1x16x8xf32>,
    %c1_27 = arith.constant 1 : index
    %c0_28 = arith.constant 0 : index
    %c0_29 = arith.constant 0 : index
    %22 = vector.load %arg5[%c1_27, %c0_28, %c0_29] : memref<4x16x8xf32, #tpu.memory_space<vmem>>, vector<1x16x8xf32>
    %23 = vector.shape_cast %22 : vector<1x16x8xf32> to vector<16x8xf32>
    %cst_30 = arith.constant dense<0.000000e+00> : vector<16x8xf32>
    %24 = tpu.matmul %3, %23, %cst_30 {dimension_numbers = #tpu.dot_dimension_numbers<[1], [0], [0], [1], [0, 0, 1, 1], [], []>} : vector<16x16xf32>, vector<16x8xf32>, vector<16x8xf32> -> vector<16x8xf32>
    %c0_31 = arith.constant 0 : index
    %c1_32 = arith.constant 1 : index
    %c0_33 = arith.constant 0 : index
    %c0_34 = arith.constant 0 : index
    %25 = vector.load %arg7[%c0_31, %c1_32, %c0_33, %c0_34] : memref<1x4x16x8xf32, #tpu.memory_space<vmem>>, vector<1x1x16x8xf32>
    %26 = vector.shape_cast %25 : vector<1x1x16x8xf32> to vector<16x8xf32>
    %27 = vector.shape_cast %24 : vector<16x8xf32> to vector<1x1x16x8xf32>
    tpu.vector_store %arg7[%c0_31, %c1_32, %c0_33, %c0_34], %27 {strides = array<i32>} : memref<1x4x16x8xf32, #tpu.memory_space<vmem>>, vector<1x1x16x8xf32>,
    %c2 = arith.constant 2 : index
    %c0_35 = arith.constant 0 : index
    %c0_36 = arith.constant 0 : index
    %28 = vector.load %arg4[%c2, %c0_35, %c0_36] : memref<4x16x8xf32, #tpu.memory_space<vmem>>, vector<1x16x8xf32>
    %29 = vector.shape_cast %28 : vector<1x16x8xf32> to vector<16x8xf32>
    %cst_37 = arith.constant dense<0.000000e+00> : vector<16x8xf32>
    %30 = tpu.matmul %1, %29, %cst_37 {dimension_numbers = #tpu.dot_dimension_numbers<[1], [0], [0], [1], [0, 0, 1, 1], [], []>} : vector<16x16xf32>, vector<16x8xf32>, vector<16x8xf32> -> vector<16x8xf32>
    %c0_38 = arith.constant 0 : index
    %c2_39 = arith.constant 2 : index
    %c0_40 = arith.constant 0 : index
    %c0_41 = arith.constant 0 : index
    %31 = vector.load %arg6[%c0_38, %c2_39, %c0_40, %c0_41] : memref<1x4x16x8xf32, #tpu.memory_space<vmem>>, vector<1x1x16x8xf32>
    %32 = vector.shape_cast %31 : vector<1x1x16x8xf32> to vector<16x8xf32>
    %33 = vector.shape_cast %30 : vector<16x8xf32> to vector<1x1x16x8xf32>
    tpu.vector_store %arg6[%c0_38, %c2_39, %c0_40, %c0_41], %33 {strides = array<i32>} : memref<1x4x16x8xf32, #tpu.memory_space<vmem>>, vector<1x1x16x8xf32>,
    %c2_42 = arith.constant 2 : index
    %c0_43 = arith.constant 0 : index
    %c0_44 = arith.constant 0 : index
    %34 = vector.load %arg5[%c2_42, %c0_43, %c0_44] : memref<4x16x8xf32, #tpu.memory_space<vmem>>, vector<1x16x8xf32>
    %35 = vector.shape_cast %34 : vector<1x16x8xf32> to vector<16x8xf32>
    %cst_45 = arith.constant dense<0.000000e+00> : vector<16x8xf32>
    %36 = tpu.matmul %3, %35, %cst_45 {dimension_numbers = #tpu.dot_dimension_numbers<[1], [0], [0], [1], [0, 0, 1, 1], [], []>} : vector<16x16xf32>, vector<16x8xf32>, vector<16x8xf32> -> vector<16x8xf32>
    %c0_46 = arith.constant 0 : index
    %c2_47 = arith.constant 2 : index
    %c0_48 = arith.constant 0 : index
    %c0_49 = arith.constant 0 : index
    %37 = vector.load %arg7[%c0_46, %c2_47, %c0_48, %c0_49] : memref<1x4x16x8xf32, #tpu.memory_space<vmem>>, vector<1x1x16x8xf32>
    %38 = vector.shape_cast %37 : vector<1x1x16x8xf32> to vector<16x8xf32>
    %39 = vector.shape_cast %36 : vector<16x8xf32> to vector<1x1x16x8xf32>
    tpu.vector_store %arg7[%c0_46, %c2_47, %c0_48, %c0_49], %39 {strides = array<i32>} : memref<1x4x16x8xf32, #tpu.memory_space<vmem>>, vector<1x1x16x8xf32>,
    %c3 = arith.constant 3 : index
    %c0_50 = arith.constant 0 : index
    %c0_51 = arith.constant 0 : index
    %40 = vector.load %arg4[%c3, %c0_50, %c0_51] : memref<4x16x8xf32, #tpu.memory_space<vmem>>, vector<1x16x8xf32>
    %41 = vector.shape_cast %40 : vector<1x16x8xf32> to vector<16x8xf32>
    %cst_52 = arith.constant dense<0.000000e+00> : vector<16x8xf32>
    %42 = tpu.matmul %1, %41, %cst_52 {dimension_numbers = #tpu.dot_dimension_numbers<[1], [0], [0], [1], [0, 0, 1, 1], [], []>} : vector<16x16xf32>, vector<16x8xf32>, vector<16x8xf32> -> vector<16x8xf32>
    %c0_53 = arith.constant 0 : index
    %c3_54 = arith.constant 3 : index
    %c0_55 = arith.constant 0 : index
    %c0_56 = arith.constant 0 : index
    %43 = vector.load %arg6[%c0_53, %c3_54, %c0_55, %c0_56] : memref<1x4x16x8xf32, #tpu.memory_space<vmem>>, vector<1x1x16x8xf32>
    %44 = vector.shape_cast %43 : vector<1x1x16x8xf32> to vector<16x8xf32>
    %45 = vector.shape_cast %42 : vector<16x8xf32> to vector<1x1x16x8xf32>
    tpu.vector_store %arg6[%c0_53, %c3_54, %c0_55, %c0_56], %45 {strides = array<i32>} : memref<1x4x16x8xf32, #tpu.memory_space<vmem>>, vector<1x1x16x8xf32>,
    %c3_57 = arith.constant 3 : index
    %c0_58 = arith.constant 0 : index
    %c0_59 = arith.constant 0 : index
    %46 = vector.load %arg5[%c3_57, %c0_58, %c0_59] : memref<4x16x8xf32, #tpu.memory_space<vmem>>, vector<1x16x8xf32>
    %47 = vector.shape_cast %46 : vector<1x16x8xf32> to vector<16x8xf32>
    %cst_60 = arith.constant dense<0.000000e+00> : vector<16x8xf32>
    %48 = tpu.matmul %3, %47, %cst_60 {dimension_numbers = #tpu.dot_dimension_numbers<[1], [0], [0], [1], [0, 0, 1, 1], [], []>} : vector<16x16xf32>, vector<16x8xf32>, vector<16x8xf32> -> vector<16x8xf32>
    %c0_61 = arith.constant 0 : index
    %c3_62 = arith.constant 3 : index
    %c0_63 = arith.constant 0 : index
    %c0_64 = arith.constant 0 : index
    %49 = vector.load %arg7[%c0_61, %c3_62, %c0_63, %c0_64] : memref<1x4x16x8xf32, #tpu.memory_space<vmem>>, vector<1x1x16x8xf32>
    %50 = vector.shape_cast %49 : vector<1x1x16x8xf32> to vector<16x8xf32>
    %51 = vector.shape_cast %48 : vector<16x8xf32> to vector<1x1x16x8xf32>
    tpu.vector_store %arg7[%c0_61, %c3_62, %c0_63, %c0_64], %51 {strides = array<i32>} : memref<1x4x16x8xf32, #tpu.memory_space<vmem>>, vector<1x1x16x8xf32>,
    return
  }
  func.func @transform_0(%arg0: i32, %arg1: i32) -> (i32, i32, i32) {
    %c0_i32 = arith.constant 0 : i32
    %c0_i32_0 = arith.constant 0 : i32
    return %arg0, %arg1, %c0_i32 : i32, i32, i32
  }
  func.func @transform_1(%arg0: i32, %arg1: i32) -> (i32, i32, i32) {
    %c0_i32 = arith.constant 0 : i32
    %c0_i32_0 = arith.constant 0 : i32
    return %arg0, %arg1, %c0_i32 : i32, i32, i32
  }
  func.func @transform_2(%arg0: i32, %arg1: i32) -> (i32, i32, i32) {
    %c0_i32 = arith.constant 0 : i32
    %c0_i32_0 = arith.constant 0 : i32
    %c0_i32_1 = arith.constant 0 : i32
    %c0_i32_2 = arith.constant 0 : i32
    return %c0_i32, %c0_i32_0, %c0_i32_1 : i32, i32, i32
  }
  func.func @transform_3(%arg0: i32, %arg1: i32) -> (i32, i32, i32) {
    %c0_i32 = arith.constant 0 : i32
    %c0_i32_0 = arith.constant 0 : i32
    %c0_i32_1 = arith.constant 0 : i32
    %c0_i32_2 = arith.constant 0 : i32
    return %c0_i32, %c0_i32_0, %c0_i32_1 : i32, i32, i32
  }
  func.func @transform_4(%arg0: i32, %arg1: i32) -> (i32, i32, i32, i32) {
    %c0_i32 = arith.constant 0 : i32
    %c0_i32_0 = arith.constant 0 : i32
    %c0_i32_1 = arith.constant 0 : i32
    return %arg0, %c0_i32, %arg1, %c0_i32_0 : i32, i32, i32, i32
  }
  func.func @transform_5(%arg0: i32, %arg1: i32) -> (i32, i32, i32, i32) {
    %c0_i32 = arith.constant 0 : i32
    %c0_i32_0 = arith.constant 0 : i32
    %c0_i32_1 = arith.constant 0 : i32
    return %arg0, %c0_i32, %arg1, %c0_i32_0 : i32, i32, i32, i32
  }
}

</mosaic_0001>

<bundles_post_ra>
// kernel: tpu_custom_call.1
= control target key start
LH: loop header
LB: loop body
LE: loop exit
PB: predicated region body
PF: predicated region fallthrough
CT: control target
= control target key end

     0   :  { %s1398_s18 = smov 0   ;;  %s1400_s19 = smov 0   ;;  %s1541_s0 = inlined_call_operand.vmem [shape: f32[2,16,16], index: 0, kind: input, shape index: {}]   ;;  %s1542_s1 = inlined_call_operand.vmem [shape: f32[2,16,16], index: 1, kind: input, shape index: {}]   ;;  %s1543_s2 = inlined_call_operand.vmem [shape: f32[4,16,8], index: 2, kind: input, shape index: {}]   ;;  %s1544_s3 = inlined_call_operand.vmem [shape: f32[4,16,8], index: 3, kind: input, shape index: {}]   ;;  %s1545_s4 = inlined_call_operand.vmem [shape: f32[2,4,16,8], index: 4, kind: output, shape index: {0}]   ;;  %s1546_s5 = inlined_call_operand.vmem [shape: f32[2,4,16,8], index: 5, kind: output, shape index: {1}]  }
   0x1   :  { %s1402_s20 = smov 0  }
   0x2 LB: > { %s28_s21 = sadd.s32 1, %s1362_s19  ;;  %p1145_p0 = scmp.ge.s32.totalorder %s1366_s20, 1  ;;  %s1366_s20 = sphi %s1402_s20, %s16_s20   ;;  %s1362_s19 = sphi %s1400_s19, %s1548_s19   ;;  %s1358_s18 = sphi %s1398_s18, %s1547_s18  }
   0x3   : > { %p30_p1 = scmp.ge.s32.totalorder %s28_s21, 2  ;;  %p230_p2 = scmp.lt.s32.totalorder %s1366_s20, 3 }
   0x5   : > { %s1550_s21 = smov (%p30_p1, %s28_s21), 0  ;;  %p231_p3 = pnand %p1145_p0, %p230_p2 }
   0x6   : > { %v328_v0 = vld [vmem:[%s1543_s2] sm:$0xff] (!%p231_p3)  ;;  %v329_v1 = vld [vmem:[%s1543_s2 + $0x8] sm:$0xff] (!%p231_p3)  ;;  %p285_p4 = scmp.lt.s32.totalorder (!%p231_p3), %s1358_s18, 1  ;;  %v1158_v5 = vld [vmem:[%s1543_s2 + $0x10] sm:$0xff] (!%p231_p3)  ;;  %vm330_vm0 = vcmask (!%p231_p3), 130048   ;;  %vm412_vm1 = vcmask (!%p231_p3), 64512  }
   0x7   : > { %234 = sbr.rel (%p231_p3) target bundleno = 246 (0xf6), region = 36  ;;  %v415_v2 = vld [vmem:[%s1544_s3] sm:$0xff] (!%p231_p3)  ;;  %v1288_v3 = vpack.c.bf16 (!%p231_p3), %v329_v1, %v328_v0  ;;  %v416_v4 = vld [vmem:[%s1544_s3 + $0x8] sm:$0xff] (!%p231_p3)  ;;  %v1159_v6 = vld [vmem:[%s1543_s2 + $0x18] sm:$0xff] (!%p231_p3) }
   0x8   : > { %v1292_v7 = vpack.c.bf16 (!%p231_p3), %v416_v4, %v415_v2  ;;  %v1296_v8 = vpack.c.bf16 (!%p231_p3), %v1159_v6, %v1158_v5  ;;  %v1164_v9 = vld [vmem:[%s1544_s3 + $0x10] sm:$0xff] (!%p231_p3)  ;;  %v1165_v10 = vld [vmem:[%s1544_s3 + $0x18] sm:$0xff] (!%p231_p3)  ;;  %v1170_v12 = vld [vmem:[%s1543_s2 + $0x20] sm:$0xff] (!%p231_p3) }
   0x9   : > { %1289 = vmatprep.subr.bf16.mxu0 (!%p231_p3), %v1288_v3  ;;  %v1300_v11 = vpack.c.bf16 (!%p231_p3), %v1165_v10, %v1164_v9  ;;  %v1171_v13 = vld [vmem:[%s1543_s2 + $0x28] sm:$0xff] (!%p231_p3)  ;;  %v1176_v14 = vld [vmem:[%s1544_s3 + $0x20] sm:$0xff] (!%p231_p3)  ;;  %v1182_v22 = vld [vmem:[%s1543_s2 + $0x30] sm:$0xff] (!%p231_p3) }
   0xa   : > { %1293 = vmatprep.subr.bf16.mxu1 (!%p231_p3), %v1292_v7  ;;  %1291 = vmatpush3.bf16.msra.mxu0 (!%p231_p3), %v1288_v3  ;;  %v1177_v15 = vld [vmem:[%s1544_s3 + $0x28] sm:$0xff] (!%p231_p3)  ;;  %v1304_v20 = vpack.c.bf16 (!%p231_p3), %v1171_v13, %v1170_v12  ;;  %v1183_v23 = vld [vmem:[%s1543_s2 + $0x38] sm:$0xff] (!%p231_p3)  ;;  %v1188_v24 = vld [vmem:[%s1544_s3 + $0x30] sm:$0xff] (!%p231_p3) }
   0xb   : > { %1295 = vmatpush3.bf16.msra.mxu1 (!%p231_p3), %v1292_v7  ;;  %1297 = vmatprep.subr.bf16.mxu0 (!%p231_p3), %v1296_v8  ;;  %v1308_v21 = vpack.c.bf16 (!%p231_p3), %v1177_v15, %v1176_v14  ;;  %v1189_v25 = vld [vmem:[%s1544_s3 + $0x38] sm:$0xff] (!%p231_p3)  ;;  %v1312_v26 = vpack.c.bf16 (!%p231_p3), %v1183_v23, %v1182_v22 }
   0xc   : > { %1301 = vmatprep.subr.bf16.mxu1 (!%p231_p3), %v1300_v11  ;;  %v1316_v27 = vpack.c.bf16 (!%p231_p3), %v1189_v25, %v1188_v24 }
   0xe   : > { %s1552_s18 = smov (!%p285_p4, %s1358_s18), 1 }
   0xf   : > { %s1196_s13 = sshll.u32 %s1552_s18, 4  ;;  %s1198_s15 = sshll.u32 %s1552_s18, 6 }
  0x10   : > { %s292_s24 = scalar_lea.vmem %s1541_s0, %s1196_s13  ;;  %s302_s6 = scalar_lea.vmem %s1542_s1, %s1196_s13 }
  0x11   : > { %v324_v16 = vld [vmem:[%s292_s24] sm:$0xff]  ;;  %v325_v17 = vld [vmem:[%s292_s24 + $0x8] sm:$0xff]  ;;  %s1493_s22 = scalar_lea.vmem %s1545_s4, %s1198_s15  ;;  %s1498_s25 = scalar_lea.vmem %s1546_s5, %s1198_s15 }
  0x12   : > { %1236 = vmatprep.mubr.msk.f32.mxu0 %vm330_vm0, %v324_v16  ;;  %v326_v18 = vld [vmem:[%s302_s6] sm:$0xff]  ;;  %v327_v19 = vld [vmem:[%s302_s6 + $0x8] sm:$0xff] }
  0x13   : > { %1243 = vmatprep.mubr.msk.f32.mxu1 %vm330_vm0, %v326_v18  ;;  %1237 = vmatmul.mubr.msk.f32.vlgmr.msra.gmra.mrb[0].mxu0 %vm330_vm0, %v325_v17 }
  0x14   : > { %1244 = vmatmul.mubr.msk.f32.vlgmr.msra.gmra.mrb[0].mxu1 %vm330_vm0, %v327_v19  ;;  %1299 = vmatpush3.bf16.msra.mxu0 %v1296_v8 }
  0x15   : > { %1303 = vmatpush3.bf16.msra.mxu1 %v1300_v11  ;;  %1250 = vmatprep.mubr.msk.f32.mxu0 %vm330_vm0, %v324_v16 }
  0x16   : > { %1257 = vmatprep.mubr.msk.f32.mxu1 %vm330_vm0, %v326_v18  ;;  %1305 = vmatprep.subr.bf16.mxu0 %v1304_v20 }
  0x17   : > { %1309 = vmatprep.subr.bf16.mxu1 %v1308_v21  ;;  %1251 = vmatmul.mubr.msk.f32.vlgmr.msra.gmra.mrb[2].mxu0 %vm330_vm0, %v325_v17 }
  0x18   : > { %1258 = vmatmul.mubr.msk.f32.vlgmr.msra.gmra.mrb[2].mxu1 %vm330_vm0, %v327_v19  ;;  %1307 = vmatpush3.bf16.msra.mxu0 %v1304_v20 }
  0x19   : > { %1311 = vmatpush3.bf16.msra.mxu1 %v1308_v21  ;;  %1264 = vmatprep.mubr.msk.f32.mxu0 %vm330_vm0, %v324_v16 }
  0x1a   : > { %1271 = vmatprep.mubr.msk.f32.mxu1 %vm330_vm0, %v326_v18  ;;  %1313 = vmatprep.subr.bf16.mxu0 %v1312_v26 }
  0x1b   : > { %1317 = vmatprep.subr.bf16.mxu1 %v1316_v27  ;;  %1265 = vmatmul.mubr.msk.f32.vlgmr.msra.gmra.mrb[4].mxu0 %vm330_vm0, %v325_v17 }
  0x1c   : > { %1272 = vmatmul.mubr.msk.f32.vlgmr.msra.gmra.mrb[4].mxu1 %vm330_vm0, %v327_v19  ;;  %1315 = vmatpush3.bf16.msra.mxu0 %v1312_v26 }
  0x1d   : > { %1319 = vmatpush3.bf16.msra.mxu1 %v1316_v27  ;;  %1278 = vmatprep.mubr.msk.f32.mxu0 %vm330_vm0, %v324_v16 }
  0x1e   : > { %1285 = vmatprep.mubr.msk.f32.mxu1 %vm330_vm0, %v326_v18 }
  0x1f   : > { %1279 = vmatmul.mubr.msk.f32.vlgmr.msra.gmra.mrb[6].mxu0 %vm330_vm0, %v325_v17 }
  0x20   : > { %1286 = vmatmul.mubr.msk.f32.vlgmr.msra.gmra.mrb[6].mxu1 %vm330_vm0, %v327_v19 }
  0xe6   : > { %v1238_v28 = vpop.f32.mrb[0].mxu0 }
  0xe7   : > { %414 = vst.msk [vmem:[%s1493_s22 + $0x8] sm:$0xff] %vm412_vm1, %v1238_v28  ;;  %v1245_v29 = vpop.f32.mrb[0].mxu1  ;;  %v403_v30 = vpop.f32.mrb[1].mxu0 }
  0xe8   : > { %499 = vst.msk [vmem:[%s1498_s25 + $0x8] sm:$0xff] %vm412_vm1, %v1245_v29  ;;  %413 = vst.msk [vmem:[%s1493_s22] sm:$0xff] %vm412_vm1, %v403_v30  ;;  %v489_v31 = vpop.f32.mrb[1].mxu1 }
  0xe9   : > { %498 = vst.msk [vmem:[%s1498_s25] sm:$0xff] %vm412_vm1, %v489_v31 }
  0xea   : > { %v1252_v32 = vpop.f32.mrb[2].mxu0 }
  0xeb   : > { %1163 = vst.msk [vmem:[%s1493_s22 + $0x18] sm:$0xff] %vm412_vm1, %v1252_v32  ;;  %v1259_v33 = vpop.f32.mrb[2].mxu1  ;;  %v569_v34 = vpop.f32.mrb[3].mxu0 }
  0xec   : > { %1169 = vst.msk [vmem:[%s1498_s25 + $0x18] sm:$0xff] %vm412_vm1, %v1259_v33  ;;  %1162 = vst.msk [vmem:[%s1493_s22 + $0x10] sm:$0xff] %vm412_vm1, %v569_v34  ;;  %v650_v35 = vpop.f32.mrb[3].mxu1 }
  0xed   : > { %1168 = vst.msk [vmem:[%s1498_s25 + $0x10] sm:$0xff] %vm412_vm1, %v650_v35 }
  0xee   : > { %v1266_v36 = vpop.f32.mrb[4].mxu0 }
  0xef   : > { %1175 = vst.msk [vmem:[%s1493_s22 + $0x28] sm:$0xff] %vm412_vm1, %v1266_v36  ;;  %v1273_v37 = vpop.f32.mrb[4].mxu1  ;;  %v731_v38 = vpop.f32.mrb[5].mxu0 }
  0xf0   : > { %1181 = vst.msk [vmem:[%s1498_s25 + $0x28] sm:$0xff] %vm412_vm1, %v1273_v37  ;;  %1174 = vst.msk [vmem:[%s1493_s22 + $0x20] sm:$0xff] %vm412_vm1, %v731_v38  ;;  %v812_v39 = vpop.f32.mrb[5].mxu1 }
  0xf1   : > { %1180 = vst.msk [vmem:[%s1498_s25 + $0x20] sm:$0xff] %vm412_vm1, %v812_v39 }
  0xf2   : > { %v1280_v40 = vpop.f32.mrb[6].mxu0 }
  0xf3   : > { %1187 = vst.msk [vmem:[%s1493_s22 + $0x38] sm:$0xff] %vm412_vm1, %v1280_v40  ;;  %v1287_v41 = vpop.f32.mrb[6].mxu1  ;;  %v893_v42 = vpop.f32.mrb[7].mxu0 }
  0xf4   : > { %1193 = vst.msk [vmem:[%s1498_s25 + $0x38] sm:$0xff] %vm412_vm1, %v1287_v41  ;;  %1186 = vst.msk [vmem:[%s1493_s22 + $0x30] sm:$0xff] %vm412_vm1, %v893_v42  ;;  %v974_v43 = vpop.f32.mrb[7].mxu1 }
  0xf5   : > { %1192 = vst.msk [vmem:[%s1498_s25 + $0x30] sm:$0xff] %vm412_vm1, %v974_v43 }
  0xf6 PF: > { %s16_s20 = sadd.s32 1, %s1366_s20   ;;  %s1547_s18 = smov %s1362_s19 }
  0xf7   : > { %p13_p5 = scmp.ge.s32.totalorder %s16_s20, 4   ;;  %s1548_s19 = smov %s1550_s21 }
  0xf9   :  { %15 = sbr.rel (!%p13_p5) target bundleno = 2 (0x2), region = 93 }

</bundles_post_ra>
